<compile_context>
chip_gen: v7x
topology: tpu7x:2x2x1
jax: 0.10.0
libtpu: 0.0.40
codegen_flags: <defaults>
</compile_context>

<pallas_src>
import jax
import jax.numpy as jnp
from jax.experimental import pallas as pl
from jax.experimental.pallas import tpu as pltpu

_MIB = 1 << 20


def _se_kernel_chw(x_ref, w1t_ref, w2t_ref, o_ref):
    # x_ref  : (BB, C, HW)  activation block, HW lane-dense, native dtype
    # w1t_ref: (C, Cr)      fc1 weight, pre-transposed, 1/HW folded in
    # w2t_ref: (Cr, C)      fc2 weight, pre-transposed
    # Squeeze: f32 accumulation directly from the ref (no f32 tile copy).
    y = jnp.sum(x_ref[...], axis=-1, dtype=jnp.float32)              # (BB, C)
    # Excite: fc1 -> ReLU -> fc2 -> sigmoid, one lane-major matmul pair.
    h = jnp.maximum(
        jnp.dot(y, w1t_ref[...].astype(jnp.float32),
                preferred_element_type=jnp.float32), 0.0)            # (BB, Cr)
    s = jax.nn.sigmoid(
        jnp.dot(h, w2t_ref[...].astype(jnp.float32),
                preferred_element_type=jnp.float32))                 # (BB, C)
    # Scale: big tile stays in native dtype; only the tiny gate is cast.
    o_ref[...] = x_ref[...] * s[:, :, None].astype(o_ref.dtype)


def _se_kernel_hwc(x_ref, w1t_ref, w2t_ref, o_ref):
    # Channels-last variant: x_ref (BB, HW, C), C lane-dense.  Used when HW is
    # not a multiple of 128 (e.g. 7x7=49) but C is, keeping stores unmasked.
    y = jnp.sum(x_ref[...], axis=1, dtype=jnp.float32)               # (BB, C)
    h = jnp.maximum(
        jnp.dot(y, w1t_ref[...].astype(jnp.float32),
                preferred_element_type=jnp.float32), 0.0)            # (BB, Cr)
    s = jax.nn.sigmoid(
        jnp.dot(h, w2t_ref[...].astype(jnp.float32),
                preferred_element_type=jnp.float32))                 # (BB, C)
    o_ref[...] = x_ref[...] * s[:, None, :].astype(o_ref.dtype)


def _tpu_generation():
    try:
        kind = jax.devices()[0].device_kind.lower()
    except Exception:
        kind = ""
    if "v7" in kind:
        return "v7"
    if "v5" in kind:
        return "v5"
    return "v6"


def _pick_block_batch(B, per_sample_bytes, weight_bytes, gen):
    """Pick samples per grid step and the scoped-VMEM limit to request.

    Budget covers 2x input + 2x output block buffers plus (double-buffered)
    weights and a 1 MiB margin.  v7x: 48 MiB budget (64 MiB physical VMEM per
    TensorCore) and a preference for an even, multi-step grid so both cores
    get work; v5e/v6e: 64 MiB budget (128 MiB physical), single core, so the
    largest block wins (and v5e's 16 MiB scoped default makes the explicit
    limit mandatory).
    """
    budget = (48 * _MIB) if gen == "v7" else (64 * _MIB)
    avail = budget - 2 * weight_bytes - _MIB
    max_block_bytes = avail // 4
    if per_sample_bytes > max_block_bytes:
        # TODO(synk): spatially-tiled two-pass (pool w/ accumulator, then
        # rescale) fallback for per-sample activations exceeding the budget.
        raise ValueError(
            f"SELayer Pallas kernel: one sample needs {per_sample_bytes} B per"
            f" VMEM buffer but only {max_block_bytes} B fit on {gen} with"
            " double-buffering; spatial tiling is not implemented.")

    divisors = [d for d in range(1, B + 1)
                if B % d == 0 and d * per_sample_bytes <= max_block_bytes]
    bb = max(divisors)

    if gen == "v7" and B > 1:
        # Batch axis is "parallel": give both TensorCores work.  Prefer an
        # even step count, and >= 4 steps when blocks can stay >= 4 MiB.
        even_multi = [d for d in divisors if (B // d) % 2 == 0]
        if even_multi:
            min_block = min(4 * _MIB, bb * per_sample_bytes)
            four_plus = [d for d in even_multi
                         if (B // d) >= 4 and d * per_sample_bytes >= min_block]
            bb = max(four_plus) if four_plus else max(even_multi)
    return bb, budget


def se_layer(x_nchw, w1, w2, *, block_batch=None, donate_input=False):
    """SE forward.  x_nchw: (B, C, H, W); w1: (C//r, C); w2: (C, C//r) in
    PyTorch nn.Linear (out_features, in_features) layout, bias-free.

    donate_input=True aliases the input to the output (in-place rescale); it
    is only safe if the caller actually donates x (jit donate_argnums),
    otherwise XLA inserts a copy.
    """
    B, C, H, W = x_nchw.shape
    HW = H * W
    Cr = w1.shape[0]
    itemsize = jnp.dtype(x_nchw.dtype).itemsize

    # Lane-dense layout choice for the big tile.
    channels_last = (HW % 128 != 0) and (C % 128 == 0)

    x = x_nchw.reshape(B, C, HW)
    if channels_last:
        x = jnp.swapaxes(x, 1, 2)                 # (B, HW, C), C on lanes
        kernel = _se_kernel_hwc
    else:
        kernel = _se_kernel_chw                   # (B, C, HW), HW on lanes

    # One-time XLA transposes so the excitation is lane-major; fold the 1/HW
    # mean scale into w1t (positive scalar commutes through matmul + ReLU).
    w1t = w1.T.astype(jnp.float32) * jnp.float32(1.0 / HW)   # (C, Cr)
    w2t = w2.T.astype(jnp.float32)                           # (Cr, C)

    per_sample_bytes = C * HW * itemsize
    weight_bytes = (w1t.size + w2t.size) * 4
    gen = _tpu_generation()
    if block_batch is None:
        bb, vmem_limit = _pick_block_batch(B, per_sample_bytes, weight_bytes, gen)
    else:
        bb = block_batch
        vmem_limit = (48 * _MIB) if gen == "v7" else (64 * _MIB)
    assert B % bb == 0, "block_batch must divide the batch size"

    blk = (bb, HW, C) if channels_last else (bb, C, HW)

    cost = pl.CostEstimate(
        flops=2 * B * C * HW + 4 * B * C * Cr,    # pool + rescale + 2 matmuls
        transcendentals=B * C,                    # sigmoid
        bytes_accessed=2 * B * C * HW * itemsize + weight_bytes,
    )

    out = pl.pallas_call(
        kernel,
        out_shape=jax.ShapeDtypeStruct(x.shape, x.dtype),
        grid_spec=pltpu.PrefetchScalarGridSpec(
            num_scalar_prefetch=0,
            grid=(B // bb,),
            in_specs=[
                pl.BlockSpec(blk, lambda b: (b, 0, 0)),
                pl.BlockSpec((C, Cr), lambda b: (0, 0)),
                pl.BlockSpec((Cr, C), lambda b: (0, 0)),
            ],
            out_specs=pl.BlockSpec(blk, lambda b: (b, 0, 0)),
        ),
        compiler_params=pltpu.CompilerParams(
            dimension_semantics=("parallel",),
            vmem_limit_bytes=int(vmem_limit),
        ),
        cost_estimate=cost,
        input_output_aliases={0: 0} if donate_input else {},
    )(x, w1t, w2t)

    if channels_last:
        out = jnp.swapaxes(out, 1, 2)
    return out.reshape(B, C, H, W)


def se_layer_ref(x_nchw, w1, w2):
    """Pure-JAX reference matching the PyTorch forward."""
    y = jnp.mean(x_nchw, axis=(2, 3))                 # (B, C)
    y = jnp.maximum(y @ w1.T, 0.0)                    # (B, C//r)
    y = jax.nn.sigmoid(y @ w2.T)                      # (B, C)
    return x_nchw * y[:, :, None, None]


if __name__ == "__main__":
    key = jax.random.PRNGKey(0)

    # Case 1: HW lane-dense path (HW = 256 is a multiple of 128), channel=32,
    # reduction=16 as in the module defaults.
    B, C, H, W = 2, 32, 16, 16
    Cr = C // 16
    kx, k1, k2, key = jax.random.split(key, 4)
    x = jax.random.normal(kx, (B, C, H, W), dtype=jnp.float32)
    w1 = jax.random.normal(k1, (Cr, C), dtype=jnp.float32) * 0.1   # (C//r, C)
    w2 = jax.random.normal(k2, (C, Cr), dtype=jnp.float32) * 0.1   # (C, C//r)
    out = jax.block_until_ready(se_layer(x, w1, w2))
    ref = se_layer_ref(x, w1, w2)
    assert out.shape == (B, C, H, W)
    assert jnp.allclose(out, ref, atol=1e-5, rtol=1e-5)

    # Case 2: channels-last path (HW = 49 not 128-aligned, C = 128 is).
    B2, C2, H2, W2 = 2, 128, 7, 7
    Cr2 = C2 // 16
    kx2, k12, k22 = jax.random.split(key, 3)
    x2 = jax.random.normal(kx2, (B2, C2, H2, W2), dtype=jnp.float32)
    w12 = jax.random.normal(k12, (Cr2, C2), dtype=jnp.float32) * 0.1
    w22 = jax.random.normal(k22, (C2, Cr2), dtype=jnp.float32) * 0.1
    out2 = jax.block_until_ready(se_layer(x2, w12, w22))
    ref2 = se_layer_ref(x2, w12, w22)
    assert out2.shape == (B2, C2, H2, W2)
    assert jnp.allclose(out2, ref2, atol=1e-5, rtol=1e-5)

    print("KERNEL_OK")
</pallas_src>

<mosaic_0001>
module attributes {stable_mosaic.version = 11 : i64} {
  func.func @_se_kernel_chw(%arg0: i32, %arg1: memref<2x32x256xf32, #tpu.memory_space<vmem>>, %arg2: memref<32x2xf32, #tpu.memory_space<vmem>>, %arg3: memref<2x32xf32, #tpu.memory_space<vmem>>, %arg4: memref<2x32x256xf32, #tpu.memory_space<vmem>>) attributes {dimension_semantics = [#tpu.dimension_semantics<parallel>], iteration_bounds = array<i64: 1>, scalar_prefetch = 0 : i64, scratch_operands = 0 : i64, tpu.core_type = #tpu.core_type<tc>, window_params = [{transform_indices = @transform_0, window_bounds = array<i64: 2, 32, 256>}, {pipeline_mode = #tpu.pipeline_mode<synchronous>, transform_indices = @transform_1, window_bounds = array<i64: 32, 2>}, {pipeline_mode = #tpu.pipeline_mode<synchronous>, transform_indices = @transform_2, window_bounds = array<i64: 2, 32>}, {transform_indices = @transform_3, window_bounds = array<i64: 2, 32, 256>}]} {
    %c0 = arith.constant 0 : index
    %c0_0 = arith.constant 0 : index
    %c0_1 = arith.constant 0 : index
    %0 = vector.load %arg1[%c0, %c0_0, %c0_1] : memref<2x32x256xf32, #tpu.memory_space<vmem>>, vector<2x32x256xf32>
    %cst = arith.constant dense<0.000000e+00> : vector<2x32xf32>
    %1 = vector.multi_reduction <add>, %0, %cst [2] : vector<2x32x256xf32> to vector<2x32xf32>
    %c0_2 = arith.constant 0 : index
    %c0_3 = arith.constant 0 : index
    %2 = vector.load %arg2[%c0_2, %c0_3] : memref<32x2xf32, #tpu.memory_space<vmem>>, vector<32x2xf32>
    %cst_4 = arith.constant dense<0.000000e+00> : vector<2x2xf32>
    %3 = tpu.matmul %1, %2, %cst_4 {dimension_numbers = #tpu.dot_dimension_numbers<[1], [0], [0], [1], [0, 0, 1, 1], [], []>} : vector<2x32xf32>, vector<32x2xf32>, vector<2x2xf32> -> vector<2x2xf32>
    %cst_5 = arith.constant 0.000000e+00 : f32
    %4 = vector.broadcast %cst_5 : f32 to vector<2x2xf32>
    %5 = arith.maximumf %3, %4 : vector<2x2xf32>
    %c0_6 = arith.constant 0 : index
    %c0_7 = arith.constant 0 : index
    %6 = vector.load %arg3[%c0_6, %c0_7] : memref<2x32xf32, #tpu.memory_space<vmem>>, vector<2x32xf32>
    %cst_8 = arith.constant dense<0.000000e+00> : vector<2x32xf32>
    %7 = tpu.matmul %5, %6, %cst_8 {dimension_numbers = #tpu.dot_dimension_numbers<[1], [0], [0], [1], [0, 0, 1, 1], [], []>} : vector<2x2xf32>, vector<2x32xf32>, vector<2x32xf32> -> vector<2x32xf32>
    %8 = arith.negf %7 : vector<2x32xf32>
    %9 = math.exp %8 : vector<2x32xf32>
    %cst_9 = arith.constant 1.000000e+00 : f32
    %10 = vector.broadcast %cst_9 : f32 to vector<2x32xf32>
    %11 = arith.addf %10, %9 : vector<2x32xf32>
    %12 = arith.divf %10, %11 : vector<2x32xf32>
    %c0_10 = arith.constant 0 : index
    %c0_11 = arith.constant 0 : index
    %c0_12 = arith.constant 0 : index
    %13 = vector.load %arg1[%c0_10, %c0_11, %c0_12] : memref<2x32x256xf32, #tpu.memory_space<vmem>>, vector<2x32x256xf32>
    %14 = vector.shape_cast %12 : vector<2x32xf32> to vector<2x32x1xf32>
    %15 = vector.broadcast %14 : vector<2x32x1xf32> to vector<2x32x256xf32>
    %16 = arith.mulf %13, %15 : vector<2x32x256xf32>
    %c0_13 = arith.constant 0 : index
    %c0_14 = arith.constant 0 : index
    %c0_15 = arith.constant 0 : index
    %17 = vector.load %arg4[%c0_13, %c0_14, %c0_15] : memref<2x32x256xf32, #tpu.memory_space<vmem>>, vector<2x32x256xf32>
    tpu.vector_store %arg4[%c0_13, %c0_14, %c0_15], %16 {strides = array<i32>} : memref<2x32x256xf32, #tpu.memory_space<vmem>>, vector<2x32x256xf32>,
    return
  }
  func.func @transform_0(%arg0: i32) -> (i32, i32, i32) {
    %c0_i32 = arith.constant 0 : i32
    %c0_i32_0 = arith.constant 0 : i32
    %c0_i32_1 = arith.constant 0 : i32
    return %arg0, %c0_i32, %c0_i32_0 : i32, i32, i32
  }
  func.func @transform_1(%arg0: i32) -> (i32, i32) {
    %c0_i32 = arith.constant 0 : i32
    %c0_i32_0 = arith.constant 0 : i32
    %c0_i32_1 = arith.constant 0 : i32
    return %c0_i32, %c0_i32_0 : i32, i32
  }
  func.func @transform_2(%arg0: i32) -> (i32, i32) {
    %c0_i32 = arith.constant 0 : i32
    %c0_i32_0 = arith.constant 0 : i32
    %c0_i32_1 = arith.constant 0 : i32
    return %c0_i32, %c0_i32_0 : i32, i32
  }
  func.func @transform_3(%arg0: i32) -> (i32, i32, i32) {
    %c0_i32 = arith.constant 0 : i32
    %c0_i32_0 = arith.constant 0 : i32
    %c0_i32_1 = arith.constant 0 : i32
    return %arg0, %c0_i32, %c0_i32_0 : i32, i32, i32
  }
}

</mosaic_0001>

<bundles_post_ra>
// kernel: tpu_custom_call.1
= control target key start
LH: loop header
LB: loop body
LE: loop exit
PB: predicated region body
PF: predicated region fallthrough
CT: control target
= control target key end

     0   :  { %8 = vsyncpa [#allocation3], 0  ;;  %s692_s0 = inlined_call_operand.hbm [shape: f32[2,32,256], index: 0, kind: input, shape index: {}]   ;;  %s693_s1 = inlined_call_operand.hbm [shape: f32[32,2], index: 1, kind: input, shape index: {}]   ;;  %s694_s2 = inlined_call_operand.hbm [shape: f32[2,32], index: 2, kind: input, shape index: {}]   ;;  %s695_s3 = inlined_call_operand.hbm [shape: f32[2,32,256], index: 3, kind: output, shape index: {}]  }
   0x1   :  { %9 = vsyncpa [#allocation6], 0 }
   0x2   :  { %10 = vsyncpa [#allocation4], 0  ;;  %s543_s12 = smov [#allocation5]   ;;  %s449_s16 = scalar_lea.hbm %s693_s1, 512 }
   0x3   :  { %s28_s13 = sshll.u32 %s543_s12, 4  ;;  %p450_p0 = scmp.ne.s32.totalorder %s693_s1, %s449_s16  ;;  %s29_s13 = int_to_ptr.vmem [resolvable:$true] %s28_s13 }
   0x4   :  { %p453_p1 = scmp.lt.u32.totalorder %s449_s16, %s693_s1 }
   0x6   :  { %p455_p2 = pnand %p453_p1, %p450_p0 }
   0x8   :  { %458 = shalt.err (!%p455_p2)
}
   0x9   :  { %s459_s21 = scalar_lea.vmem %s29_s13, 512  ;;  %p464_p4 = scmp.lt.s32.totalorder %s29_s13, %s29_s13 }
   0xa   :  { %p460_p3 = scmp.ne.s32.totalorder %s29_s13, %s459_s21  ;;  %p465_p5 = scmp.lt.s32.totalorder %s459_s21, %s459_s21 }
   0xc   :  { %p466_p6 = por %p465_p5, %p464_p4 }
   0xe   :  { %p467_p7 = pnand %p466_p6, %p460_p3 }
  0x10   :  { %470 = shalt.err (!%p467_p7)
}
  0x11   :  { %s544_s22 = smov 128   ;;  %s545_s23 = smov 8  }
  0x12   :  { %34 = dma.hbm_to_vmem [thread:$0]  %s693_s1, 512, %s29_s13, [#allocation6], %s544_s22, %s544_s22, %s545_s23  }
  0x13   :  { %s546_s26 = smov [#allocation2]   ;;  %s471_s30 = scalar_lea.hbm %s692_s0, 2048 }
  0x14   :  { %s16_s27 = sshll.u32 %s546_s26, 4  ;;  %p472_p8 = scmp.ne.s32.totalorder %s692_s0, %s471_s30  ;;  %s17_s27 = int_to_ptr.vmem [resolvable:$true] %s16_s27 }
  0x15   :  { %p475_p9 = scmp.lt.u32.totalorder %s471_s30, %s692_s0 }
  0x17   :  { %p477_p10 = pnand %p475_p9, %p472_p8 }
  0x19   :  { %480 = shalt.err (!%p477_p10)
}
  0x1a   :  { %s481_s8 = scalar_lea.vmem %s17_s27, 2048  ;;  %p486_p12 = scmp.lt.s32.totalorder %s17_s27, %s17_s27 }
  0x1b   :  { %p482_p11 = scmp.ne.s32.totalorder %s17_s27, %s481_s8  ;;  %p487_p13 = scmp.lt.s32.totalorder %s481_s8, %s481_s8 }
  0x1d   :  { %p488_p0 = por %p487_p13, %p486_p12 }
  0x1f   :  { %p489_p1 = pnand %p488_p0, %p482_p11 }
  0x21   :  { %492 = shalt.err (!%p489_p1)
}
  0x22   :  { %s547_s1 = smov 256   ;;  %s548_s9 = smov 16  }
  0x23   :  { %22 = dma.hbm_to_vmem [thread:$0]  %s692_s0, 2048, %s17_s27, [#allocation3], %s547_s1, %s547_s1, %s548_s9  }
  0x24   :  { %s549_s12 = smov [#allocation7]   ;;  %s493_s16 = scalar_lea.hbm %s694_s2, 32 }
  0x25   :  { %s41_s13 = sshll.u32 %s549_s12, 4  ;;  %p494_p2 = scmp.ne.s32.totalorder %s694_s2, %s493_s16  ;;  %s42_s13 = int_to_ptr.vmem [resolvable:$true] %s41_s13 }
  0x26   :  { %p497_p3 = scmp.lt.u32.totalorder %s493_s16, %s694_s2 }
  0x28   :  { %p499_p4 = pnand %p497_p3, %p494_p2 }
  0x2a   :  { %502 = shalt.err (!%p499_p4)
}
  0x2b   :  { %s503_s21 = scalar_lea.vmem %s42_s13, 32  ;;  %p508_p6 = scmp.lt.s32.totalorder %s42_s13, %s42_s13 }
  0x2c   :  { %p504_p5 = scmp.ne.s32.totalorder %s42_s13, %s503_s21  ;;  %p509_p7 = scmp.lt.s32.totalorder %s503_s21, %s503_s21 }
  0x2e   :  { %p510_p8 = por %p509_p7, %p508_p6 }
  0x30   :  { %p511_p9 = pnand %p510_p8, %p504_p5 }
  0x32   :  { %514 = shalt.err (!%p511_p9)
}
  0x33   :  { %44 = dma.hbm_to_vmem [thread:$0]  %s694_s2, 32, %s42_s13, [#allocation6]  }
  0x34   :  { %537 = dma.done.wait [#allocation3], 2048  }
  0x35   :  { %538 = vsyncadd [#allocation3], 4294965248 }
  0x36   :  { %539 = dma.done.wait [#allocation6], 544  }
  0x37   :  { %540 = vsyncadd [#allocation6], 4294966752  ;;  %v613_v0 = vld [vmem:[#allocation2 + $0x40] sm:$0xff]  ;;  %v615_v1 = vld [vmem:[#allocation2 + $0x48] sm:$0xff]  ;;  %v550_v27 = vmov 0.0|0.0   ;;  %vm551_vm0 = vmmov 0   ;;  %v106_v32 = vlaneseq }
  0x38   :  { %v617_v2 = vld [vmem:[#allocation2] sm:$0xff]  ;;  %v82_v3 = vadd.f32 %v615_v1, %v613_v0  ;;  %v621_v4 = vld [vmem:[#allocation2 + $0x8] sm:$0xff]  ;;  %v623_v5 = vld [vmem:[#allocation2 + $0x50] sm:$0xff]  ;;  %428 = vmatprep.subr.bf16.mxu0 %v550_v27  ;;  %v552_v31 = vmov 0.0   ;;  %vm117_vm1 = vcmask 130112   ;;  %vm124_vm2 = vcmask 195712  }
  0x39   :  { %v625_v6 = vld [vmem:[#allocation2 + $0x58] sm:$0xff]  ;;  %v70_v7 = vadd.f32 %v621_v4, %v617_v2  ;;  %v629_v8 = vld [vmem:[#allocation2 + $0x10] sm:$0xff]  ;;  %v637_v12 = vld [vmem:[#allocation2 + $0x60] sm:$0xff]  ;;  %420 = vmatprep.mubr.msk.f32.mxu0 %vm551_vm0, %v552_v31  ;;  %423 = vmatprep.subr.mxu1 %v552_v31  ;;  %v107_v33 = vand.u32 127, %v106_v32  ;;  %v109_v38 = vshrl.u32 %v106_v32, 7  ;;  %vm131_vm3 = vcmask 261312  }
  0x3a   :  { %v631_v9 = vld [vmem:[#allocation2 + $0x18] sm:$0xff]  ;;  %83 = vadd.xlane.f32.xlu1 %v82_v3  ;;  %v85_v10 = vadd.f32 %v625_v6, %v623_v5  ;;  %v639_v13 = vld [vmem:[#allocation2 + $0x68] sm:$0xff]  ;;  %v641_v14 = vld [vmem:[#allocation2 + $0x20] sm:$0xff]  ;;  %425 = vmatprep.mubr.msk.f32.mxu1 %vm551_vm0, %v552_v31  ;;  %vm152_vm4 = vcmask 1041409   ;;  %vm154_vm5 = vcmask 261120   ;;  %vm233_vm6 = vcmask 1041408  }
  0x3b   :  { %71 = vadd.xlane.f32.xlu0 %v70_v7  ;;  %v73_v11 = vadd.f32 %v631_v9, %v629_v8  ;;  %v643_v15 = vld [vmem:[#allocation2 + $0x28] sm:$0xff]  ;;  %v88_v16 = vadd.f32 %v639_v13, %v637_v12  ;;  %v649_v18 = vld [vmem:[#allocation2 + $0x70] sm:$0xff]  ;;  %v651_v19 = vld [vmem:[#allocation2 + $0x78] sm:$0xff]  ;;  %v112_v36 = vadd.s32 4294967288, %v107_v33  ;;  %v119_v37 = vadd.s32 4294967280, %v107_v33  ;;  %s553_s2 = smov [#allocation8]  }
  0x3c   :  { %v76_v17 = vadd.f32 %v643_v15, %v641_v14  ;;  %v653_v20 = vld [vmem:[#allocation2 + $0x30] sm:$0xff]  ;;  %v655_v21 = vld [vmem:[#allocation2 + $0x38] sm:$0xff]  ;;  %v91_v22 = vadd.f32 %v651_v19, %v649_v18  ;;  %v94_v24 = vld [vmem:[#allocation5] sm:$0xff]  ;;  %v126_v42 = vadd.s32 4294967272, %v107_v33  ;;  %v110_v44 = vsub.s32 %v107_v33, %v109_v38  ;;  %s388_s23 = sshll.u32 %s553_s2, 4  ;;  %s389_s23 = int_to_ptr.vmem [resolvable:$true] %s388_s23 }
  0x3d   :  { %v79_v23 = vadd.f32 %v655_v21, %v653_v20  ;;  %v95_v25 = vld [vmem:[#allocation5 + $0x8] sm:$0xff]  ;;  %v96_v28 = vld [vmem:[#allocation5 + $0x10] sm:$0xff]  ;;  %v97_v29 = vld [vmem:[#allocation5 + $0x18] sm:$0xff]  ;;  %v115_v40 = vsub.s32 %v112_v36, %v109_v38  ;;  %v122_v43 = vsub.s32 %v119_v37, %v109_v38  ;;  %vm229_vm7 = vcmask 15360   ;;  %s515_s24 = scalar_lea.vmem %s389_s23, 2048  ;;  %p520_p11 = scmp.lt.s32.totalorder %s389_s23, %s389_s23 }
  0x3e   :  { %86 = vadd.xlane.f32.xlu1 %v85_v10  ;;  %v429_v26 = vpack.c.bf16 %v95_v25, %v94_v24  ;;  %v432_v30 = vpack.c.bf16 %v97_v29, %v96_v28  ;;  %v129_v48 = vsub.s32 %v126_v42, %v109_v38  ;;  %v228_v7 = vld [vmem:[#allocation7] sm:$0x3]  ;;  %v334_v29 = vsub.s32 1, %v109_v38  ;;  %p516_p10 = scmp.ne.s32.totalorder %s389_s23, %s515_s24  ;;  %p521_p12 = scmp.lt.s32.totalorder %s515_s24, %s515_s24 }
  0x3f   :  { %74 = vadd.xlane.f32.xlu0 %v73_v11  ;;  %424 = vmatpush3.msk.msra.mxu1 %vm233_vm6, %v228_v7 }
  0x40   :  { %430 = vmatpush3.bf16.msra.mxu0 %v429_v26  ;;  %v315_v26 = vsub.s32 0, %v109_v38  ;;  %p522_p13 = por %p521_p12, %p520_p11 }
  0x41   :  { %431 = vmatprep.subr.bf16.mxu0 %v550_v27 }
  0x42   :  { %89 = vadd.xlane.f32.xlu1 %v88_v16  ;;  %p523_p0 = pnand %p522_p13, %p516_p10 }
  0x43   :  { %77 = vadd.xlane.f32.xlu0 %v76_v17 }
  0x44   :  { %433 = vmatpush3.bf16.msra.mxu0 %v432_v30 }
  0x46   :  { %92 = vadd.xlane.f32.xlu1 %v91_v22 }
  0x47   :  { %80 = vadd.xlane.f32.xlu0 %v79_v23 }
  0xc7   :  { %v84_v34 = vpop.xlane.xlu1 %83 }
  0xc8   :  { %v72_v35 = vpop.xlane.xlu0 %71  ;;  %v136_v51 = vrot.slane %v84_v34, %v110_v44 }
  0xc9   :  { %v111_v53 = vrot.slane %v72_v35, %v110_v44 }
  0xcb   :  { %v87_v39 = vpop.xlane.xlu1 %86 }
  0xcc   :  { %v75_v41 = vpop.xlane.xlu0 %74  ;;  %v140_v46 = vrot.slane %v87_v39, %v115_v40 }
  0xcd   :  { %v116_v49 = vrot.slane %v75_v41, %v115_v40 }
  0xce   :  { %v141_v55 = vsel %vm117_vm1, %v140_v46, %v136_v51 }
  0xcf   :  { %v90_v45 = vpop.xlane.xlu1 %89  ;;  %v118_v58 = vsel %vm117_vm1, %v116_v49, %v111_v53 }
  0xd0   :  { %v78_v47 = vpop.xlane.xlu0 %77  ;;  %v145_v50 = vrot.slane %v90_v45, %v122_v43 }
  0xd1   :  { %v123_v52 = vrot.slane %v78_v47, %v122_v43 }
  0xd2   :  { %v146_v59 = vsel %vm124_vm2, %v145_v50, %v141_v55 }
  0xd3   :  { %v93_v54 = vpop.xlane.xlu1 %92  ;;  %v125_v61 = vsel %vm124_vm2, %v123_v52, %v118_v58 }
  0xd4   :  { %v150_v56 = vrot.slane %v93_v54, %v129_v48  ;;  %v81_v57 = vpop.xlane.xlu0 %80 }
  0xd5   :  { %v130_v60 = vrot.slane %v81_v57, %v129_v48 }
  0xd6   :  { %v151_v62 = vsel %vm131_vm3, %v150_v56, %v146_v59 }
  0xd7   :  { %v132_v63 = vsel %vm131_vm3, %v130_v60, %v125_v61 }
  0xd8   :  { %v153_v3 = vsel %vm152_vm4, %v151_v62, %v132_v63 }
  0xd9   :  { %421 = vmatmul.mubr.msk.f32.vlgmr.msra.gmra.mrb[0].mxu0 %vm154_vm5, %v153_v3 }
 0x1ac   :  { %v223_v10 = vpop.f32.mrb[0].mxu0 }
 0x1ad   :  { %v227_v11 = vmax.f32 %v223_v10, 0.0  ;;  %v422_v16 = vpop.f32.mrb[1].mxu0 }
 0x1af   :  { %426 = vmatmul.mubr.msk.f32.vlgmr.msra.gmra.mrb[0].mxu1 %vm229_vm7, %v227_v11 }
 0x282   :  { %v303_v17 = vpop.f32.mrb[0].mxu1 }
 0x283   :  { %v404_v22 = vmul.f32 -1.442695, %v303_v17  ;;  %v427_v23 = vpop.f32.mrb[1].mxu1 }
 0x285   :  { %445 = vpow2.f32 %v404_v22 }
 0x28f   :  { %v446_v24 = vpop.eup %445 }
 0x290   :  { %v310_v25 = vadd.f32 1.0, %v446_v24 }
 0x292   :  { %447 = vrcp.f32 %v310_v25 }
 0x29c   :  { %v448_v27 = vpop.eup %447 }
 0x29d   :  { %v316_v28 = vrot.slane %v448_v27, %v315_v26  ;;  %v335_v30 = vrot.slane %v448_v27, %v334_v29 }
 0x29f   :  { %322 = vbcast.lane.b32.xlu1 %v316_v28, 264  ;;  %318 = vbcast.lane.b32.xlu0 %v316_v28, 256 }
 0x2a3   :  { %326 = vbcast.lane.b32.xlu1 %v316_v28, 272  ;;  %337 = vbcast.lane.b32.xlu0 %v335_v30, 256 }
 0x2a7   :  { %330 = vbcast.lane.b32.xlu1 %v316_v28, 280  ;;  %345 = vbcast.lane.b32.xlu0 %v335_v30, 272 }
 0x2ab   :  { %341 = vbcast.lane.b32.xlu1 %v335_v30, 264 }
 0x2af   :  { %349 = vbcast.lane.b32.xlu1 %v335_v30, 280 }
 0x311   :  { %v323_v31 = vpop.permute.xlu1 %322  ;;  %v319_v32 = vpop.permute.xlu0 %318 }
 0x312   :  { %v353_v33 = vmul.f32 %v323_v31, %v629_v8  ;;  %v354_v34 = vmul.f32 %v323_v31, %v631_v9  ;;  %v351_v35 = vmul.f32 %v319_v32, %v617_v2  ;;  %v352_v36 = vmul.f32 %v319_v32, %v621_v4 }
 0x314   :  { %369 = vst [vmem:[#allocation8 + $0x10] sm:$0xff] %v353_v33  ;;  %370 = vst [vmem:[#allocation8 + $0x18] sm:$0xff] %v354_v34 }
 0x315   :  { %367 = vst [vmem:[#allocation8] sm:$0xff] %v351_v35  ;;  %368 = vst [vmem:[#allocation8 + $0x8] sm:$0xff] %v352_v36  ;;  %v327_v37 = vpop.permute.xlu1 %326  ;;  %v338_v38 = vpop.permute.xlu0 %337 }
 0x316   :  { %v355_v39 = vmul.f32 %v327_v37, %v641_v14  ;;  %v356_v40 = vmul.f32 %v327_v37, %v643_v15  ;;  %v359_v41 = vmul.f32 %v338_v38, %v613_v0  ;;  %v360_v8 = vmul.f32 %v338_v38, %v615_v1 }
 0x318   :  { %371 = vst [vmem:[#allocation8 + $0x20] sm:$0xff] %v355_v39  ;;  %372 = vst [vmem:[#allocation8 + $0x28] sm:$0xff] %v356_v40 }
 0x319   :  { %375 = vst [vmem:[#allocation8 + $0x40] sm:$0xff] %v359_v41  ;;  %376 = vst [vmem:[#allocation8 + $0x48] sm:$0xff] %v360_v8  ;;  %v331_v2 = vpop.permute.xlu1 %330  ;;  %v346_v4 = vpop.permute.xlu0 %345 }
 0x31a   :  { %v357_v9 = vmul.f32 %v331_v2, %v653_v20  ;;  %v358_v42 = vmul.f32 %v331_v2, %v655_v21  ;;  %v363_v43 = vmul.f32 %v346_v4, %v637_v12  ;;  %v364_v14 = vmul.f32 %v346_v4, %v639_v13 }
 0x31c   :  { %373 = vst [vmem:[#allocation8 + $0x30] sm:$0xff] %v357_v9  ;;  %374 = vst [vmem:[#allocation8 + $0x38] sm:$0xff] %v358_v42 }
 0x31d   :  { %379 = vst [vmem:[#allocation8 + $0x60] sm:$0xff] %v363_v43  ;;  %380 = vst [vmem:[#allocation8 + $0x68] sm:$0xff] %v364_v14  ;;  %v342_v0 = vpop.permute.xlu1 %341 }
 0x31e   :  { %v361_v1 = vmul.f32 %v342_v0, %v623_v5  ;;  %v362_v15 = vmul.f32 %v342_v0, %v625_v6 }
 0x320   :  { %377 = vst [vmem:[#allocation8 + $0x50] sm:$0xff] %v361_v1  ;;  %378 = vst [vmem:[#allocation8 + $0x58] sm:$0xff] %v362_v15 }
 0x321   :  { %v350_v20 = vpop.permute.xlu1 %349 }
 0x322   :  { %v365_v21 = vmul.f32 %v350_v20, %v649_v18  ;;  %v366_v12 = vmul.f32 %v350_v20, %v651_v19 }
 0x324   :  { %381 = vst [vmem:[#allocation8 + $0x70] sm:$0xff] %v365_v21  ;;  %382 = vst [vmem:[#allocation8 + $0x78] sm:$0xff] %v366_v12 }
 0x325   :  { %526 = shalt.err (!%p523_p0)
}
 0x326   :  { %s527_s27 = scalar_lea.hbm %s695_s3, 2048 }
 0x327   :  { %p528_p1 = scmp.ne.s32.totalorder %s695_s3, %s527_s27  ;;  %p531_p2 = scmp.lt.u32.totalorder %s527_s27, %s695_s3 }
 0x329   :  { %p533_p3 = pnand %p531_p2, %p528_p1 }
 0x32b   :  { %536 = shalt.err (!%p533_p3)
}
 0x32c   :  { %394 = dma.vmem_to_hbm [thread:$0]  %s389_s23, 2048, %s695_s3, [#allocation4], %s547_s1, %s547_s1, %s548_s9  }
 0x32d   :  { %541 = dma.done.wait [#allocation4], 2048  }
 0x32e   :  { %542 = vsyncadd [#allocation4], 4294965248 }
 0x32f   :  { %398 = vsyncpa [#allocation3], 1 }
 0x330   :  { %399 = vsyncpa [#allocation6], 1 }
 0x331   :  { %400 = vsyncpa [#allocation4], 1 }

</bundles_post_ra>
